<compile_context>
chip_gen: v7x
topology: tpu7x:2x2x1
jax: 0.10.0
libtpu: 0.0.40
codegen_flags: <defaults>
</compile_context>

<pallas_src>
import functools

import jax
import jax.numpy as jnp
from jax.experimental import pallas as pl
from jax.experimental.pallas import tpu as pltpu


# --------------------------------------------------------------------------- #
# Kernel
# --------------------------------------------------------------------------- #
def _se_kernel(x_ref, w1t_ref, w2t_ref, o_ref, *, inv_hw):
    """x_ref/o_ref block: (Bt, C, HW); w1t: (C, C//r); w2t: (C//r, C)."""
    # --- squeeze: global average pool (f32 accumulation, true H*W divisor) ---
    y = jnp.sum(x_ref[...], axis=2, dtype=jnp.float32) * inv_hw        # (Bt, C)

    # --- excitation: fc1 -> ReLU -> fc2 -> hardsigmoid (row-vector form) ----
    h = jnp.dot(y, w1t_ref[...], preferred_element_type=jnp.float32)   # (Bt, C//r)
    h = jnp.maximum(h, 0.0)
    z = jnp.dot(h, w2t_ref[...], preferred_element_type=jnp.float32)   # (Bt, C)
    g = jnp.clip(z * (1.0 / 6.0) + 0.5, 0.0, 1.0).astype(o_ref.dtype)  # hardsigmoid

    # --- scale: re-read x from VMEM (short live range; VMEM reload is cheap)
    #     and broadcast the per-(b, c) gate across the HW lanes. ------------
    o_ref[...] = x_ref[...] * g[:, :, None]


# --------------------------------------------------------------------------- #
# Sizing helpers
# --------------------------------------------------------------------------- #
def _round_up(x, m):
    return (x + m - 1) // m * m


def _sublane_multiple(dtype):
    return {4: 8, 2: 16, 1: 32}.get(jnp.dtype(dtype).itemsize, 8)


def _padded_tile_bytes(rows, cols, dtype):
    """VMEM footprint of one (rows, cols) tile after (sublane, 128) padding."""
    itemsize = jnp.dtype(dtype).itemsize
    return _round_up(rows, _sublane_multiple(dtype)) * _round_up(cols, 128) * itemsize


def _vmem_capacity_bytes():
    try:
        info = pltpu.get_tpu_info()
        cap = getattr(info, "vmem_capacity_bytes", None)
        if cap:
            return int(cap)
    except Exception:
        pass
    return 64 << 20  # conservative (v7x-class) default


def _choose_batch_block(batch, padded_slab_bytes, vmem_cap):
    """Batches per grid step, sized from padded VMEM tiles, per chip generation."""
    small_vmem = vmem_cap <= (65 << 20)          # v7x-class: 64 MiB VMEM, 2 TensorCores
    if small_vmem:
        target_block = 4 << 20                   # per-block bytes (amortize ~0.35 us/step)
        buffer_budget = 44 << 20                 # 2x-in + 2x-out double buffers
    else:
        target_block = 8 << 20                   # v5e/v6e: 128 MiB VMEM -> bigger blocks
        buffer_budget = 96 << 20
    slab = max(padded_slab_bytes, 1)
    bt = max(1, min(batch, target_block // slab))
    bt = max(1, min(bt, buffer_budget // (4 * slab)))
    if small_vmem and batch >= 2:
        bt = min(bt, max(1, batch // 2))         # keep >= 2 grid steps for the 2 TCs
    return max(bt, 1), small_vmem


# --------------------------------------------------------------------------- #
# Wrapper
# --------------------------------------------------------------------------- #
def se_module(x, w1, w2):
    """x: (B, C, H, W) NCHW; w1: (C//r, C); w2: (C, C//r).  Returns (B, C, H, W)."""
    B, C, H, W = x.shape
    HW = H * W
    Cr = w1.shape[0]
    itemsize = jnp.dtype(x.dtype).itemsize

    # Native NCHW feed: reshape is free, NO XLA transpose. The kernel reduces /
    # broadcasts along the last (HW) axis directly.
    x2 = x.reshape(B, C, HW)
    w1t = jnp.transpose(w1)                      # (C, C//r) -- tiny, one-time
    w2t = jnp.transpose(w2)                      # (C//r, C)

    padded_slab = _padded_tile_bytes(C, HW, x.dtype)
    vmem_cap = _vmem_capacity_bytes()
    bt, small_vmem = _choose_batch_block(B, padded_slab, vmem_cap)

    # Pad the batch up to a bt multiple instead of shrinking bt to a divisor
    # (prime / odd batches would otherwise degenerate into many tiny steps).
    num_blocks = -(-B // bt)
    B_pad = num_blocks * bt
    if B_pad != B:
        x2 = jnp.pad(x2, ((0, B_pad - B), (0, 0), (0, 0)))
    grid = (num_blocks,)

    # TODO(synk): if even a single padded slab (bt == 1) exceeds the VMEM budget
    # (huge C*HW), tile HW with an "arbitrary" reduction grid axis (two-pass
    # reduce + scale) instead of keeping the whole slab resident.

    w_bytes_padded = (_padded_tile_bytes(w1t.shape[0], w1t.shape[1], w1t.dtype) +
                      _padded_tile_bytes(w2t.shape[0], w2t.shape[1], w2t.dtype))
    need = 4 * bt * padded_slab + 2 * w_bytes_padded + (4 << 20)
    limit_cap = (56 << 20) if small_vmem else (112 << 20)
    vmem_limit = int(min(max(need, 32 << 20), limit_cap))

    cost = pl.CostEstimate(
        flops=2 * 2 * B * C * Cr + 2 * B * C * HW,   # two tiny FCs + pool + scale
        transcendentals=0,
        bytes_accessed=2 * B * C * HW * itemsize
        + (w1t.size + w2t.size) * jnp.dtype(w1.dtype).itemsize)

    kernel = functools.partial(_se_kernel, inv_hw=1.0 / HW)

    out = pl.pallas_call(
        kernel,
        out_shape=jax.ShapeDtypeStruct((B_pad, C, HW), x.dtype),
        grid_spec=pltpu.PrefetchScalarGridSpec(
            num_scalar_prefetch=0,
            grid=grid,
            in_specs=[
                pl.BlockSpec((bt, C, HW), lambda b: (b, 0, 0)),
                pl.BlockSpec(w1t.shape, lambda b: (0, 0)),
                pl.BlockSpec(w2t.shape, lambda b: (0, 0)),
            ],
            out_specs=pl.BlockSpec((bt, C, HW), lambda b: (b, 0, 0)),
        ),
        compiler_params=pltpu.CompilerParams(
            dimension_semantics=("parallel",),
            vmem_limit_bytes=vmem_limit),
        cost_estimate=cost,
    )(x2, w1t, w2t)

    if B_pad != B:
        out = out[:B]
    return out.reshape(B, C, H, W)


# --------------------------------------------------------------------------- #
# Reference + tests
# --------------------------------------------------------------------------- #
def se_module_ref(x, w1, w2):
    """Pure-JAX reference mirroring the PyTorch module."""
    y = jnp.mean(x, axis=(2, 3))                                        # (B, C)
    y = jnp.maximum(jnp.dot(y, w1.T, precision=jax.lax.Precision.HIGHEST), 0.0)
    y = jnp.dot(y, w2.T, precision=jax.lax.Precision.HIGHEST)           # (B, C)
    y = jnp.clip(y / 6.0 + 0.5, 0.0, 1.0)                               # hardsigmoid
    return x * y[:, :, None, None]


def _run_case(B, C, H, W, reduction, key):
    kx, k1, k2 = jax.random.split(key, 3)
    x = jax.random.normal(kx, (B, C, H, W), dtype=jnp.float32)
    # Linear(C, C//r, bias=False).weight -> (C//r, C); Linear(C//r, C).weight -> (C, C//r)
    w1 = jax.random.normal(k1, (C // reduction, C), dtype=jnp.float32) * 0.1
    w2 = jax.random.normal(k2, (C, C // reduction), dtype=jnp.float32) * 0.1

    out = jax.block_until_ready(se_module(x, w1, w2))
    ref = se_module_ref(x, w1, w2)
    assert out.shape == (B, C, H, W)
    assert jnp.allclose(out, ref, atol=1e-4, rtol=1e-4), (
        f"mismatch vs reference for shape {(B, C, H, W)}")


if __name__ == "__main__":
    key = jax.random.PRNGKey(0)
    ka, kb, kc = jax.random.split(key, 3)
    # HW = 256 (lane-aligned spatial), small C.
    _run_case(2, 16, 16, 16, 4, ka)
    # C = 128, HW = 49 (typical MobileNetV3 late-stage SE block).
    _run_case(2, 128, 7, 7, 4, kb)
    # Odd batch: exercises the pad-to-bt-multiple path on 2-TC parts.
    _run_case(5, 32, 8, 8, 4, kc)
    print("KERNEL_OK")
</pallas_src>

<mosaic_0001>
module attributes {stable_mosaic.version = 11 : i64} {
  func.func @_se_kernel(%arg0: i32, %arg1: memref<1x16x256xf32, #tpu.memory_space<vmem>>, %arg2: memref<16x4xf32, #tpu.memory_space<vmem>>, %arg3: memref<4x16xf32, #tpu.memory_space<vmem>>, %arg4: memref<1x16x256xf32, #tpu.memory_space<vmem>>) attributes {dimension_semantics = [#tpu.dimension_semantics<parallel>], iteration_bounds = array<i64: 2>, scalar_prefetch = 0 : i64, scratch_operands = 0 : i64, tpu.core_type = #tpu.core_type<tc>, window_params = [{transform_indices = @transform_0, window_bounds = array<i64: 1, 16, 256>}, {pipeline_mode = #tpu.pipeline_mode<synchronous>, transform_indices = @transform_1, window_bounds = array<i64: 16, 4>}, {pipeline_mode = #tpu.pipeline_mode<synchronous>, transform_indices = @transform_2, window_bounds = array<i64: 4, 16>}, {transform_indices = @transform_3, window_bounds = array<i64: 1, 16, 256>}]} {
    %c0 = arith.constant 0 : index
    %c0_0 = arith.constant 0 : index
    %c0_1 = arith.constant 0 : index
    %0 = vector.load %arg1[%c0, %c0_0, %c0_1] : memref<1x16x256xf32, #tpu.memory_space<vmem>>, vector<1x16x256xf32>
    %cst = arith.constant dense<0.000000e+00> : vector<1x16xf32>
    %1 = vector.multi_reduction <add>, %0, %cst [2] : vector<1x16x256xf32> to vector<1x16xf32>
    %cst_2 = arith.constant 3.906250e-03 : f32
    %2 = vector.broadcast %cst_2 : f32 to vector<1x16xf32>
    %3 = arith.mulf %1, %2 : vector<1x16xf32>
    %c0_3 = arith.constant 0 : index
    %c0_4 = arith.constant 0 : index
    %4 = vector.load %arg2[%c0_3, %c0_4] : memref<16x4xf32, #tpu.memory_space<vmem>>, vector<16x4xf32>
    %cst_5 = arith.constant dense<0.000000e+00> : vector<1x4xf32>
    %5 = tpu.matmul %3, %4, %cst_5 {dimension_numbers = #tpu.dot_dimension_numbers<[1], [0], [0], [1], [0, 0, 1, 1], [], []>} : vector<1x16xf32>, vector<16x4xf32>, vector<1x4xf32> -> vector<1x4xf32>
    %cst_6 = arith.constant 0.000000e+00 : f32
    %6 = vector.broadcast %cst_6 : f32 to vector<1x4xf32>
    %7 = arith.maximumf %5, %6 : vector<1x4xf32>
    %c0_7 = arith.constant 0 : index
    %c0_8 = arith.constant 0 : index
    %8 = vector.load %arg3[%c0_7, %c0_8] : memref<4x16xf32, #tpu.memory_space<vmem>>, vector<4x16xf32>
    %cst_9 = arith.constant dense<0.000000e+00> : vector<1x16xf32>
    %9 = tpu.matmul %7, %8, %cst_9 {dimension_numbers = #tpu.dot_dimension_numbers<[1], [0], [0], [1], [0, 0, 1, 1], [], []>} : vector<1x4xf32>, vector<4x16xf32>, vector<1x16xf32> -> vector<1x16xf32>
    %cst_10 = arith.constant 0.166666672 : f32
    %10 = vector.broadcast %cst_10 : f32 to vector<1x16xf32>
    %11 = arith.mulf %9, %10 : vector<1x16xf32>
    %cst_11 = arith.constant 5.000000e-01 : f32
    %12 = vector.broadcast %cst_11 : f32 to vector<1x16xf32>
    %13 = arith.addf %11, %12 : vector<1x16xf32>
    %cst_12 = arith.constant 0.000000e+00 : f32
    %cst_13 = arith.constant 1.000000e+00 : f32
    %14 = vector.broadcast %cst_12 : f32 to vector<1x16xf32>
    %15 = arith.maximumf %14, %13 : vector<1x16xf32>
    %16 = vector.broadcast %cst_13 : f32 to vector<1x16xf32>
    %17 = arith.minimumf %16, %15 : vector<1x16xf32>
    %c0_14 = arith.constant 0 : index
    %c0_15 = arith.constant 0 : index
    %c0_16 = arith.constant 0 : index
    %18 = vector.load %arg1[%c0_14, %c0_15, %c0_16] : memref<1x16x256xf32, #tpu.memory_space<vmem>>, vector<1x16x256xf32>
    %19 = vector.shape_cast %17 : vector<1x16xf32> to vector<1x16x1xf32>
    %20 = vector.broadcast %19 : vector<1x16x1xf32> to vector<1x16x256xf32>
    %21 = arith.mulf %18, %20 : vector<1x16x256xf32>
    %c0_17 = arith.constant 0 : index
    %c0_18 = arith.constant 0 : index
    %c0_19 = arith.constant 0 : index
    %22 = vector.load %arg4[%c0_17, %c0_18, %c0_19] : memref<1x16x256xf32, #tpu.memory_space<vmem>>, vector<1x16x256xf32>
    tpu.vector_store %arg4[%c0_17, %c0_18, %c0_19], %21 {strides = array<i32>} : memref<1x16x256xf32, #tpu.memory_space<vmem>>, vector<1x16x256xf32>,
    return
  }
  func.func @transform_0(%arg0: i32) -> (i32, i32, i32) {
    %c0_i32 = arith.constant 0 : i32
    %c0_i32_0 = arith.constant 0 : i32
    %c0_i32_1 = arith.constant 0 : i32
    return %arg0, %c0_i32, %c0_i32_0 : i32, i32, i32
  }
  func.func @transform_1(%arg0: i32) -> (i32, i32) {
    %c0_i32 = arith.constant 0 : i32
    %c0_i32_0 = arith.constant 0 : i32
    %c0_i32_1 = arith.constant 0 : i32
    return %c0_i32, %c0_i32_0 : i32, i32
  }
  func.func @transform_2(%arg0: i32) -> (i32, i32) {
    %c0_i32 = arith.constant 0 : i32
    %c0_i32_0 = arith.constant 0 : i32
    %c0_i32_1 = arith.constant 0 : i32
    return %c0_i32, %c0_i32_0 : i32, i32
  }
  func.func @transform_3(%arg0: i32) -> (i32, i32, i32) {
    %c0_i32 = arith.constant 0 : i32
    %c0_i32_0 = arith.constant 0 : i32
    %c0_i32_1 = arith.constant 0 : i32
    return %arg0, %c0_i32, %c0_i32_0 : i32, i32, i32
  }
}

</mosaic_0001>

<bundles_post_ra>
// kernel: tpu_custom_call.1
= control target key start
LH: loop header
LB: loop body
LE: loop exit
PB: predicated region body
PF: predicated region fallthrough
CT: control target
= control target key end

     0   :  { %8 = vsyncpa [#allocation3], 0  ;;  %s875_s0 = inlined_call_operand.hbm [shape: f32[2,16,256], index: 0, kind: input, shape index: {}]   ;;  %s876_s1 = inlined_call_operand.vmem [shape: f32[16,4], index: 1, kind: input, shape index: {}]   ;;  %s877_s2 = inlined_call_operand.vmem [shape: f32[4,16], index: 2, kind: input, shape index: {}]   ;;  %s878_s3 = inlined_call_operand.hbm [shape: f32[2,16,256], index: 3, kind: output, shape index: {}]  }
   0x1   :  { %10 = vsyncpa [#allocation3 + $0x1], 0 }
   0x2   :  { %11 = vsyncpa [#allocation4], 0 }
   0x3   :  { %13 = vsyncpa [#allocation4 + $0x1], 0  ;;  %s700_s12 = smov 0   ;;  %s702_s13 = smov 0  }
   0x4   :  { %s704_s14 = smov 0   ;;  %s706_s15 = smov 0  }
   0x5 LB: > { %s721_s16 = sadd.s32 4294967295, %s669_s15   ;;  %s481_s17 = sadd.s32 4294967294, %s669_s15   ;;  %s669_s15 = sphi %s706_s15, %s891_s15   ;;  %s665_s14 = sphi %s704_s14, %s890_s14   ;;  %s661_s13 = sphi %s702_s13, %s889_s13   ;;  %s657_s12 = sphi %s700_s12, %s888_s12  }
   0x6   : > { %s725_s18 = sadd.s32 1, %s669_s15   ;;  %s26_s19 = sadd.s32 1, %s665_s14 }
   0x7   : > { %s23_s20 = ssub.s32 %s669_s15, %s725_s18  ;;  %p33_p0 = scmp.ne.s32.totalorder %s665_s14, %s661_s13 }
   0x8   : > { %p24_p1 = scmp.eq.s32.totalorder %s23_s20, 0  ;;  %p34_p2 = scmp.eq.s32.totalorder %s669_s15, 0 }
   0x9   : > { %p39_p3 = scmp.ne.s32.totalorder %s661_s13, %s657_s12  ;;  %p40_p4 = scmp.eq.s32.totalorder %s721_s16, 0 }
   0xa   : > { %s737_s21 = scalar_select %p24_p1, %s665_s14, %s26_s19  }
   0xb   : > { %p739_p5 = por %p34_p2, %p33_p0  ;;  %p743_p6 = por %p40_p4, %p39_p3 }
   0xc   : > { %p105_p7 = scmp.eq.s32.totalorder %s721_s16, 1  ;;  %p111_p8 = scmp.eq.s32.totalorder %s481_s17, 1 }
   0xd   : > { %p532_p10 = scmp.lt.s32.totalorder %s669_s15, 2  ;;  %s137_s26 = sand.u32 1, %s665_s14  }
   0xe   : > { %p750_p11 = por %p105_p7, %p33_p0  ;;  %p754_p12 = por %p111_p8, %p39_p3 }
   0xf   : > { %s498_s27 = sshll.u32 %s669_s15, 9  ;;  %s484_s28 = sshll.u32 %s137_s26, 5 }
  0x10   : > { %s882_s24 = scalar_select %p750_p11, 1, 0 }
  0x11   : > { %s883_s25 = scalar_select %p754_p12, 1, 0 }
  0x12   : > { %s763_s4 = scalar_lea.hbm %s875_s0, %s498_s27  ;;  %s141_s5 = scalar_lea.vmem [#allocation2], %s484_s28 }
  0x13   : > { %s148_s6 = sshll.u32 %s141_s5, 4  ;;  %p767_p13 = pnand %p532_p10, %p739_p5  ;;  %s771_s6 = int_to_ptr.vmem [resolvable:$true] %s148_s6 }
  0x14   : > { %s773_s8 = scalar_lea.sflag [#allocation3], %s137_s26  ;;  %s573_s9 = scalar_lea.hbm %s763_s4, 512 }
  0x15   : > { %p574_p0 = scmp.ne.s32.totalorder %s763_s4, %s573_s9  ;;  %p575_p1 = pneg %p767_p13 }
  0x16   : > { %s578_s17 = scalar_lea.hbm %s875_s0, 1024  ;;  %p579_p4 = scmp.lt.u32.totalorder %s763_s4, %s875_s0 }
  0x17   : > { %p576_p2 = pnand %p575_p1, %p574_p0  ;;  %p580_p5 = scmp.lt.u32.totalorder %s578_s17, %s573_s9 }
  0x18   : > { %p582_p8 = scmp.lt.u32.totalorder %s573_s9, %s763_s4 }
  0x19   : > { %p577_p3 = pneg %p576_p2  ;;  %p581_p7 = por %p580_p5, %p579_p4 }
  0x1b   : > { %p583_p10 = por %p582_p8, %p581_p7 }
  0x1d   : > { %p584_p9 = pnand %p583_p10, %p577_p3 }
  0x1f   : > { %587 = shalt.err (!%p584_p9)
}
  0x20   : > { %s588_s22 = scalar_lea.vmem %s771_s6, 512  ;;  %s671_s26 = smov [#allocation2]  }
  0x21   : > { %p589_p0 = scmp.ne.s32.totalorder %s771_s6, %s588_s22  ;;  %s593_s27 = sshll.u32 %s671_s26, 4  ;;  %s594_s27 = int_to_ptr.vmem [resolvable:$false] %s593_s27 }
  0x22   : > { %s595_s28 = scalar_lea.vmem %s594_s27, 1024  ;;  %p596_p11 = scmp.lt.s32.totalorder %s771_s6, %s594_s27 }
  0x23   : > { %p591_p2 = pnand %p589_p0, %p575_p1  ;;  %p597_p4 = scmp.lt.s32.totalorder %s595_s28, %s588_s22 }
  0x25   : > { %p592_p12 = pneg %p591_p2  ;;  %p598_p5 = por %p597_p4, %p596_p11 }
  0x27   : > { %p599_p7 = pnand %p598_p5, %p592_p12 }
  0x29   : > { %602 = shalt.err (!%p599_p7)
}
  0x2a   : > { %s672_s29 = smov 256   ;;  %s673_s30 = smov 16  }
  0x2b   : > { %527 = dma.hbm_to_vmem [thread:$0]  (!%p767_p13), %s763_s4, 512, %s771_s6, %s773_s8, %s672_s29, %s672_s29, %s673_s30  }
  0x2c   : > { %p487_p9 = scmp.ge.s32.totalorder %s669_s15, 1  ;;  %p156_p1 = scmp.lt.s32.totalorder %s669_s15, 3 }
  0x2e   : > { %p157_p3 = pnand %p487_p9, %p156_p1 }
  0x2f   : > { %s804_s5 = sand.u32 (!%p157_p3), 1, %s661_s13  }
  0x30   : > { %160 = sbr.rel (%p157_p3) target bundleno = 782 (0x30e), region = 32  ;;  %s488_s9 = sshll.u32 (!%p157_p3), %s804_s5, 5 }
  0x31   : > { %s163_s10 = scalar_lea.sflag (!%p157_p3), [#allocation3], %s804_s5  ;;  %s166_s11 = scalar_lea.vmem (!%p157_p3), [#allocation2], %s488_s9 }
  0x37   : > { %648 = dma.done.wait (%p743_p6), %s163_s10, 512  }
  0x38   : > { %650 = vsyncadd (%p743_p6), %s163_s10, 4294966784  ;;  %v189_v0 = vld [vmem:[%s166_s11] sm:$0xff]  ;;  %v190_v1 = vld [vmem:[%s166_s11 + $0x8] sm:$0xff]  ;;  %v674_v9 = vmov 0.0|0.0   ;;  %vm675_vm0 = vmmov 0   ;;  %v676_v10 = vmov 0.0   ;;  %v205_v11 = vlaneseq }
  0x39   : > { %v191_v2 = vld [vmem:[%s166_s11 + $0x10] sm:$0xff]  ;;  %v193_v3 = vadd.f32 %v190_v1, %v189_v0  ;;  %v192_v4 = vld [vmem:[%s166_s11 + $0x18] sm:$0xff]  ;;  %v201_v6 = vld [vmem:[%s876_s1] sm:$0xff]  ;;  %517 = vmatprep.subr.bf16.mxu0 %v674_v9  ;;  %509 = vmatprep.mubr.msk.f32.mxu0 %vm675_vm0, %v676_v10  ;;  %vm216_vm1 = vcmask 130112   ;;  %vm218_vm2 = vcmask 130048   ;;  %vm297_vm3 = vcmask 1043456  }
  0x3a   : > { %v196_v5 = vadd.f32 %v192_v4, %v191_v2  ;;  %v202_v7 = vld [vmem:[%s876_s1 + $0x8] sm:$0xff]  ;;  %512 = vmatprep.subr.mxu1 %v676_v10  ;;  %514 = vmatprep.mubr.msk.f32.mxu1 %vm675_vm0, %v676_v10  ;;  %v206_v12 = vand.u32 127, %v205_v11  ;;  %v208_v13 = vshrl.u32 %v205_v11, 7  ;;  %v292_v24 = vld [vmem:[%s877_s2] sm:$0xf]  ;;  %vm293_vm4 = vcmask 31744  }
  0x3b   : > { %194 = vadd.xlane.f32.xlu0 %v193_v3  ;;  %v518_v8 = vpack.c.bf16 %v202_v7, %v201_v6  ;;  %513 = vmatpush3.msk.msra.mxu1 %vm297_vm3, %v292_v24  ;;  %s188_s19 = scalar_lea.vmem [#allocation5], %s488_s9  ;;  %s499_s22 = sshll.u32 %s721_s16, 9 }
  0x3c   : > { %v211_v14 = vadd.s32 4294967288, %v206_v12  ;;  %v209_v16 = vsub.s32 %v206_v12, %v208_v13  ;;  %v377_v33 = vsub.s32 0, %v208_v13  ;;  %s408_s20 = sshll.u32 %s188_s19, 4  ;;  %s831_s28 = scalar_lea.hbm %s878_s3, %s499_s22  ;;  %s826_s20 = int_to_ptr.vmem [resolvable:$true] %s408_s20 }
  0x3d   : > { %519 = vmatpush3.bf16.msra.mxu0 %v518_v8  ;;  %s395_s29 = scalar_lea.sflag [#allocation4], %s804_s5  ;;  %s603_s30 = scalar_lea.vmem %s826_s20, 512 }
  0x3e   : > { %v214_v18 = vsub.s32 %v211_v14, %v208_v13  ;;  %p604_p6 = scmp.ne.s32.totalorder %s826_s20, %s603_s30  ;;  %p885_p11 = scmp.ne.s32.totalorder %s882_s24, 0 }
  0x3f   : > { %197 = vadd.xlane.f32.xlu0 %v196_v5  ;;  %s677_s16 = smov [#allocation5]  }
  0x40   : > { %p605_p12 = pnand %p604_p6, %p885_p11  ;;  %s607_s9 = sshll.u32 %s677_s16, 4  ;;  %s608_s9 = int_to_ptr.vmem [resolvable:$false] %s607_s9 }
  0x41   : > { %s609_s10 = scalar_lea.vmem %s608_s9, 1024  ;;  %p610_p8 = scmp.lt.s32.totalorder %s826_s20, %s608_s9 }
  0x42   : > { %p606_p13 = pneg %p605_p12  ;;  %p611_p10 = scmp.lt.s32.totalorder %s609_s10, %s603_s30 }
  0x44   : > { %p612_p0 = por %p611_p10, %p610_p8 }
  0x46   : > { %p613_p2 = pnand %p612_p0, %p606_p13 }
  0xc8   : > { %v195_v15 = vpop.xlane.xlu0 %194 }
  0xc9   : > { %v199_v17 = vmul.f32 0.00390625, %v195_v15 }
  0xcb   : > { %v210_v21 = vrot.slane %v199_v17, %v209_v16 }
  0xcc   : > { %v198_v19 = vpop.xlane.xlu0 %197 }
  0xcd   : > { %v200_v20 = vmul.f32 0.00390625, %v198_v19 }
  0xcf   : > { %v215_v22 = vrot.slane %v200_v20, %v214_v18 }
  0xd1   : > { %v217_v23 = vsel %vm216_vm1, %v215_v22, %v210_v21 }
  0xd2   : > { %510 = vmatmul.mubr.msk.f32.vlgmr.msra.gmra.mrb[0].mxu0 %vm218_vm2, %v217_v23 }
 0x1a5   : > { %v287_v25 = vpop.f32.mrb[0].mxu0 }
 0x1a6   : > { %v291_v26 = vmax.f32 %v287_v25, 0.0  ;;  %v511_v27 = vpop.f32.mrb[1].mxu0 }
 0x1a8   : > { %515 = vmatmul.mubr.msk.f32.vlgmr.msra.gmra.mrb[0].mxu1 %vm293_vm4, %v291_v26 }
 0x27b   : > { %v367_v28 = vpop.f32.mrb[0].mxu1 }
 0x27c   : > { %v371_v29 = vmul.f32 0.16666667, %v367_v28  ;;  %v516_v30 = vpop.f32.mrb[1].mxu1 }
 0x27e   : > { %v372_v31 = vadd.f32 0.5, %v371_v29 }
 0x280   : > { %v373_v32 = vmax.f32 %v372_v31, 0.0 }
 0x282   : > { %v374_v34 = vmin.f32 %v373_v32, 1.0 }
 0x284   : > { %v378_v35 = vrot.slane %v374_v34, %v377_v33 }
 0x286   : > { %380 = vbcast.lane.b32.xlu1 %v378_v35, 256 }
 0x28a   : > { %384 = vbcast.lane.b32.xlu1 %v378_v35, 264 }
 0x2f8   : > { %v381_v36 = vpop.permute.xlu1 %380 }
 0x2f9   : > { %v386_v37 = vmul.f32 %v381_v36, %v189_v0  ;;  %v387_v38 = vmul.f32 %v381_v36, %v190_v1 }
 0x2fb   : > { %390 = vst [vmem:[%s188_s19] sm:$0xff] %v386_v37  ;;  %391 = vst [vmem:[%s188_s19 + $0x8] sm:$0xff] %v387_v38 }
 0x2fc   : > { %v385_v39 = vpop.permute.xlu1 %384 }
 0x2fd   : > { %v388_v40 = vmul.f32 %v385_v39, %v191_v2  ;;  %v389_v41 = vmul.f32 %v385_v39, %v192_v4 }
 0x2ff   : > { %392 = vst [vmem:[%s188_s19 + $0x10] sm:$0xff] %v388_v40  ;;  %393 = vst [vmem:[%s188_s19 + $0x18] sm:$0xff] %v389_v41 }
 0x300   : > { %616 = shalt.err (!%p613_p2)
}
 0x301   : > { %s617_s11 = scalar_lea.hbm %s831_s28, 512  ;;  %s621_s7 = scalar_lea.hbm %s878_s3, 1024 }
 0x302   : > { %p618_p4 = scmp.ne.s32.totalorder %s831_s28, %s617_s11  ;;  %p622_p9 = scmp.lt.u32.totalorder %s831_s28, %s878_s3 }
 0x303   : > { %p623_p1 = scmp.lt.u32.totalorder %s621_s7, %s617_s11  ;;  %p625_p6 = scmp.lt.u32.totalorder %s617_s11, %s831_s28 }
 0x304   : > { %p619_p5 = pnand %p618_p4, %p885_p11 }
 0x305   : > { %p624_p3 = por %p623_p1, %p622_p9 }
 0x306   : > { %p620_p7 = pneg %p619_p5 }
 0x307   : > { %p626_p12 = por %p625_p6, %p624_p3 }
 0x309   : > { %p627_p13 = pnand %p626_p12, %p620_p7 }
 0x30b   : > { %630 = shalt.err (!%p627_p13)
}
 0x30c   : > { %s678_s17 = smov 256   ;;  %s679_s19 = smov 16  }
 0x30d   : > { %522 = dma.vmem_to_hbm [thread:$0]  (%p885_p11), %s826_s20, 512, %s831_s28, %s395_s29, %s678_s17, %s678_s17, %s679_s19  }
 0x30e PF: > { %s423_s22 = sand.u32 1, %s657_s12   ;;  %p886_p8 = scmp.ne.s32.totalorder %s883_s25, 0 }
 0x30f   : > { %p887_p10 = scmp.ge.s32.totalorder %s669_s15, 2  ;;  %s424_s26 = scalar_lea.sflag [#allocation4], %s423_s22 }
 0x311   : > { %p529_p0 = pnand %p887_p10, %p886_p8 }
 0x313   : > { %652 = dma.done.wait (!%p529_p0), %s424_s26, 512  }
 0x314   : > { %654 = vsyncadd (!%p529_p0), %s424_s26, 4294966784  ;;  %p16_p2 = scmp.ge.s32.totalorder %s725_s18, 4   ;;  %s888_s12 = smov %s661_s13 }
 0x315   : > { %s889_s13 = smov %s665_s14  ;;  %s890_s14 = smov %s737_s21 }
 0x316   : > { %s891_s15 = smov %s725_s18  ;;  %18 = sbr.rel (!%p16_p2) target bundleno = 5 (0x5), region = 77 }
 0x31d   :  { %429 = vsyncpa [#allocation3], 1 }
 0x31e   :  { %431 = vsyncpa [#allocation3 + $0x1], 1 }
 0x31f   :  { %432 = vsyncpa [#allocation4], 1 }
 0x320   :  { %434 = vsyncpa [#allocation4 + $0x1], 1 }

</bundles_post_ra>
